<compile_context>
chip_gen: v6e
topology: v6e:2x2x1
jax: 0.10.0
libtpu: 0.0.40
codegen_flags: <defaults>
</compile_context>

<pallas_src>
import jax
import jax.numpy as jnp
from jax import lax
from jax.experimental import pallas as pl
from jax.experimental.pallas import tpu as pltpu


def _round_up(v, m):
    return (v + m - 1) // m * m


def _linear_kernel(x_ref, w_ref, b_ref, o_ref, acc_ref):
    # x_ref: (TB, TK)  w_ref: (TC, TK)  b_ref: (1, TC)  o_ref: (TB, TC)
    k = pl.program_id(2)

    @pl.when(k == 0)
    def _():
        acc_ref[...] = jnp.zeros_like(acc_ref)

    # Contract on the shared feature axis directly (x @ W^T) — the MXU
    # handles this contraction natively, no transpose needed.
    acc_ref[...] += lax.dot_general(
        x_ref[...],
        w_ref[...],
        dimension_numbers=(((1,), (1,)), ((), ())),
        preferred_element_type=jnp.float32,
    )

    @pl.when(k == pl.num_programs(2) - 1)
    def _():
        o_ref[...] = (acc_ref[...] + b_ref[...].astype(jnp.float32)).astype(o_ref.dtype)


def _hw_params():
    """Generation-aware VMEM budget + preferred MXU tile size."""
    try:
        kind = jax.devices()[0].device_kind.lower()
    except Exception:
        kind = ""
    try:
        vmem_cap = int(pltpu.get_tpu_info().vmem_capacity_bytes)
    except Exception:
        # v5e/v6e: 128 MiB per TensorCore; v7x: 64 MiB. Conservative if unknown.
        vmem_cap = (128 if ("v5" in kind or "v6" in kind) else 64) * 1024 * 1024
    vmem_limit = int(vmem_cap * 0.75)          # headroom for Mosaic scratch/semaphores
    tile_budget = vmem_limit - 4 * 1024 * 1024  # extra slack for the Python-side math
    # v6e / v7x have 256x256 MXUs; v5e (and older) 128x128.
    pref = 256 if any(t in kind for t in ("v6", "v7", "7x")) else 128
    return tile_budget, vmem_limit, pref


def _select_tiles(B, Cp, F, budget, pref, sub):
    """Pick (TB, TC, TK); accounts for double-buffered in/out tiles + accumulator."""

    def fits(tb, tc, tk):
        # 2x x-tile + 2x w-tile + 2x bias + 2x out-tile + f32 accumulator
        return (2 * tb * tk + 2 * tc * tk + 2 * tc + 2 * tb * tc + tb * tc) * 4 <= budget

    b8 = _round_up(B, sub)
    # Class tile: MXU-sized when it divides the padded class dim.
    tc = pref if (Cp % pref == 0) else 128
    tc = min(tc, Cp)
    # Batch tile: largest candidate whose padding waste stays small (<~12%).
    tb = sub
    for cand in (512, 256, 128, 64, 32, 16, 8):
        if cand < sub:
            continue
        if _round_up(b8, cand) - b8 <= max(b8 // 8, 0):
            tb = cand
            break
    # Feature (K) tile: whole F when it is not a 128-multiple (full-dim block,
    # Mosaic masks the ragged tail — no x copy); else largest fitting divisor.
    if F % 128 == 0:
        k_cands = [c for c in (F, 2048, 1024, 512, 256, 128) if F % c == 0]
    else:
        k_cands = [F]
    tk = k_cands[-1]
    for c in k_cands:
        if fits(tb, tc, c):
            tk = c
            break
    while not fits(tb, tc, tk) and tb > sub:
        tb = max(sub, tb // 2)
    while not fits(tb, tc, tk) and tc > 128:
        tc = max(128, tc // 2)
    # TODO(synk): a very wide non-128-multiple F could still exceed the budget
    # here; that case would need a one-time feature pad to enable K-tiling.
    return tb, tc, tk


def make_logistic_regression(weight, bias, *, use_bf16=False):
    """Returns a jitted forward(x) computing x @ weight.T + bias (nn.Linear).

    weight: (num_classes, num_features) in PyTorch layout (never transposed).
    Params are padded once here (classes -> multiple of 128), outside the
    per-call hot path.
    """
    C, F = weight.shape
    Cp = _round_up(C, 128)
    w_p = jnp.zeros((Cp, F), weight.dtype).at[:C, :].set(weight)
    b_p = jnp.zeros((1, Cp), bias.dtype).at[0, :C].set(bias)
    if use_bf16:
        # Halves HBM/DMA bytes for W (and x below); accumulation stays f32.
        w_p = w_p.astype(jnp.bfloat16)

    tile_budget, vmem_limit, pref = _hw_params()
    sub = 16 if use_bf16 else 8  # sublane multiple for the batch tile

    @jax.jit
    def forward(x):
        B, Fx = x.shape
        assert Fx == F, "feature-dim mismatch"
        TB, TC, TK = _select_tiles(B, Cp, F, tile_budget, pref, sub)
        Bp = _round_up(_round_up(B, sub), TB)

        # Pad x only when the batch is not already a TB multiple.
        x_in = x if Bp == B else jnp.zeros((Bp, F), x.dtype).at[:B, :].set(x)
        if use_bf16:
            x_in = x_in.astype(jnp.bfloat16)

        grid = (Bp // TB, Cp // TC, pl.cdiv(F, TK))
        out_p = pl.pallas_call(
            _linear_kernel,
            out_shape=jax.ShapeDtypeStruct((Bp, Cp), jnp.float32),
            grid=grid,
            in_specs=[
                pl.BlockSpec((TB, TK), lambda i, j, k: (i, k)),   # x
                pl.BlockSpec((TC, TK), lambda i, j, k: (j, k)),   # weight (C,F) layout
                pl.BlockSpec((1, TC), lambda i, j, k: (0, j)),    # bias
            ],
            out_specs=pl.BlockSpec((TB, TC), lambda i, j, k: (i, j)),
            scratch_shapes=[pltpu.VMEM((TB, TC), jnp.float32)],
            compiler_params=pltpu.CompilerParams(
                # Reduction (feature) axis last + "arbitrary"; batch/class parallel.
                dimension_semantics=("parallel", "parallel", "arbitrary"),
                vmem_limit_bytes=vmem_limit,
            ),
        )(x_in, w_p, b_p)

        if Bp == B and Cp == C:
            return out_p
        return out_p[:B, :C]

    return forward


def _xavier_uniform(key, shape):
    # torch.nn.init.xavier_uniform_ for a (fan_out, fan_in) weight
    fan_out, fan_in = shape
    limit = (6.0 / (fan_in + fan_out)) ** 0.5
    return jax.random.uniform(key, shape, jnp.float32, -limit, limit)


if __name__ == "__main__":
    batch = 8
    num_features = 32
    num_classes = 16

    key = jax.random.PRNGKey(0)
    kx, kw, kb = jax.random.split(key, 3)

    x = jax.random.normal(kx, (batch, num_features), jnp.float32)
    weight = _xavier_uniform(kw, (num_classes, num_features))
    # nn.Linear default bias init: U(-1/sqrt(fan_in), 1/sqrt(fan_in))
    bound = 1.0 / (num_features ** 0.5)
    bias = jax.random.uniform(kb, (num_classes,), jnp.float32, -bound, bound)

    forward = make_logistic_regression(weight, bias)
    z = forward(x)
    jax.block_until_ready(z)

    # correctness check against plain JAX reference
    z_ref = x @ weight.T + bias
    assert z.shape == (batch, num_classes)
    assert jnp.allclose(z, z_ref, atol=1e-5, rtol=1e-5)

    print("KERNEL_OK")
</pallas_src>

<mosaic_0001>
module attributes {stable_mosaic.version = 11 : i64} {
  func.func @_linear_kernel(%arg0: i32, %arg1: i32, %arg2: i32, %arg3: memref<8x32xf32, #tpu.memory_space<vmem>>, %arg4: memref<128x32xf32, #tpu.memory_space<vmem>>, %arg5: memref<1x128xf32, #tpu.memory_space<vmem>>, %arg6: memref<8x128xf32, #tpu.memory_space<vmem>>, %arg7: memref<8x128xf32, #tpu.memory_space<vmem>>) attributes {dimension_semantics = [#tpu.dimension_semantics<parallel>, #tpu.dimension_semantics<parallel>, #tpu.dimension_semantics<arbitrary>], iteration_bounds = array<i64: 1, 1, 1>, scalar_prefetch = 0 : i64, scratch_operands = 1 : i64, tpu.core_type = #tpu.core_type<tc>, window_params = [{transform_indices = @transform_0, window_bounds = array<i64: 8, 32>}, {transform_indices = @transform_1, window_bounds = array<i64: 128, 32>}, {transform_indices = @transform_2, window_bounds = array<i64: 1, 128>}, {transform_indices = @transform_3, window_bounds = array<i64: 8, 128>}]} {
    %c0_i32 = arith.constant 0 : i32
    %0 = arith.cmpi eq, %arg2, %c0_i32 : i32
    %1 = arith.extui %0 : i1 to i32
    %c0_i32_0 = arith.constant 0 : i32
    %2 = arith.cmpi ne, %1, %c0_i32_0 : i32
    scf.if %2 {
      %cst_10 = arith.constant 0.000000e+00 : f32
      %12 = vector.broadcast %cst_10 : f32 to vector<8x128xf32>
      %c0_11 = arith.constant 0 : index
      %c0_12 = arith.constant 0 : index
      %13 = vector.load %arg7[%c0_11, %c0_12] : memref<8x128xf32, #tpu.memory_space<vmem>>, vector<8x128xf32>
      tpu.vector_store %arg7[%c0_11, %c0_12], %12 {strides = array<i32>} : memref<8x128xf32, #tpu.memory_space<vmem>>, vector<8x128xf32>,
    } else {
    }
    %c0 = arith.constant 0 : index
    %c0_1 = arith.constant 0 : index
    %3 = vector.load %arg7[%c0, %c0_1] : memref<8x128xf32, #tpu.memory_space<vmem>>, vector<8x128xf32>
    %c0_2 = arith.constant 0 : index
    %c0_3 = arith.constant 0 : index
    %4 = vector.load %arg3[%c0_2, %c0_3] : memref<8x32xf32, #tpu.memory_space<vmem>>, vector<8x32xf32>
    %c0_4 = arith.constant 0 : index
    %c0_5 = arith.constant 0 : index
    %5 = vector.load %arg4[%c0_4, %c0_5] : memref<128x32xf32, #tpu.memory_space<vmem>>, vector<128x32xf32>
    %cst = arith.constant dense<0.000000e+00> : vector<8x128xf32>
    %6 = tpu.matmul %4, %5, %cst {dimension_numbers = #tpu.dot_dimension_numbers<[1], [1], [0], [0], [0, 0, 1, 0], [], []>} : vector<8x32xf32>, vector<128x32xf32>, vector<8x128xf32> -> vector<8x128xf32>
    %7 = arith.addf %3, %6 : vector<8x128xf32>
    %c0_6 = arith.constant 0 : index
    %c0_7 = arith.constant 0 : index
    %8 = vector.load %arg7[%c0_6, %c0_7] : memref<8x128xf32, #tpu.memory_space<vmem>>, vector<8x128xf32>
    tpu.vector_store %arg7[%c0_6, %c0_7], %7 {strides = array<i32>} : memref<8x128xf32, #tpu.memory_space<vmem>>, vector<8x128xf32>,
    %c0_i32_8 = arith.constant 0 : i32
    %9 = arith.cmpi eq, %arg2, %c0_i32_8 : i32
    %10 = arith.extui %9 : i1 to i32
    %c0_i32_9 = arith.constant 0 : i32
    %11 = arith.cmpi ne, %10, %c0_i32_9 : i32
    scf.if %11 {
      %c0_10 = arith.constant 0 : index
      %c0_11 = arith.constant 0 : index
      %12 = vector.load %arg7[%c0_10, %c0_11] : memref<8x128xf32, #tpu.memory_space<vmem>>, vector<8x128xf32>
      %c0_12 = arith.constant 0 : index
      %c0_13 = arith.constant 0 : index
      %13 = vector.load %arg5[%c0_12, %c0_13] : memref<1x128xf32, #tpu.memory_space<vmem>>, vector<1x128xf32>
      %14 = vector.broadcast %13 : vector<1x128xf32> to vector<8x128xf32>
      %15 = arith.addf %12, %14 : vector<8x128xf32>
      %c0_14 = arith.constant 0 : index
      %c0_15 = arith.constant 0 : index
      %16 = vector.load %arg6[%c0_14, %c0_15] : memref<8x128xf32, #tpu.memory_space<vmem>>, vector<8x128xf32>
      tpu.vector_store %arg6[%c0_14, %c0_15], %15 {strides = array<i32>} : memref<8x128xf32, #tpu.memory_space<vmem>>, vector<8x128xf32>,
    } else {
    }
    return
  }
  func.func @transform_0(%arg0: i32, %arg1: i32, %arg2: i32) -> (i32, i32) {
    %c0_i32 = arith.constant 0 : i32
    return %arg0, %arg2 : i32, i32
  }
  func.func @transform_1(%arg0: i32, %arg1: i32, %arg2: i32) -> (i32, i32) {
    %c0_i32 = arith.constant 0 : i32
    return %arg1, %arg2 : i32, i32
  }
  func.func @transform_2(%arg0: i32, %arg1: i32, %arg2: i32) -> (i32, i32) {
    %c0_i32 = arith.constant 0 : i32
    %c0_i32_0 = arith.constant 0 : i32
    return %c0_i32, %arg1 : i32, i32
  }
  func.func @transform_3(%arg0: i32, %arg1: i32, %arg2: i32) -> (i32, i32) {
    %c0_i32 = arith.constant 0 : i32
    return %arg0, %arg1 : i32, i32
  }
}

</mosaic_0001>

<bundles_post_ra>
// kernel: forward.1
= control target key start
LH: loop header
LB: loop body
LE: loop exit
PB: predicated region body
PF: predicated region fallthrough
CT: control target
= control target key end

     0   :  { %8 = vsyncpa [#allocation4], 0  ;;  %s416_s0 = inlined_call_operand.hbm [shape: f32[8,32], index: 0, kind: input, shape index: {}]   ;;  %s417_s1 = inlined_call_operand.hbm [shape: f32[128,32], index: 1, kind: input, shape index: {}]   ;;  %s418_s2 = inlined_call_operand.vmem [shape: f32[1,128], index: 2, kind: input, shape index: {}]   ;;  %s419_s3 = inlined_call_operand.hbm [shape: f32[8,128], index: 3, kind: output, shape index: {}]  }
   0x1   :  { %9 = vsyncpa [#allocation7], 0 }
   0x2   :  { %10 = vsyncpa [#allocation5], 0  ;;  %s360_s12 = smov [#allocation3]   ;;  %s361_s14 = smov [#allocation6]  }
   0x3   :  { %s17_s13 = sshll.u32 %s360_s12, 4  ;;  %s26_s15 = sshll.u32 %s361_s14, 4  ;;  %s18_s13 = int_to_ptr.vmem [resolvable:$true] %s17_s13  ;;  %s27_s15 = int_to_ptr.vmem [resolvable:$true] %s26_s15 }
   0x4   :  { %s302_s16 = scalar_lea.vmem %s18_s13, 128  ;;  %p307_p1 = scmp.lt.s32.totalorder %s18_s13, %s18_s13 }
   0x5   :  { %p303_p0 = scmp.ne.s32.totalorder %s18_s13, %s302_s16  ;;  %p308_p2 = scmp.lt.s32.totalorder %s302_s16, %s302_s16 }
   0x7   :  { %p309_p3 = por %p308_p2, %p307_p1 }
   0x9   :  { %p310_p4 = pnand %p309_p3, %p303_p0 }
   0xb   :  { %313 = shalt.err (!%p310_p4)
}
   0xc   :  { %20 = dma.hbm_to_vmem [thread:$0]  %s416_s0, 128, %s18_s13, [#allocation4]  }
   0xd   :  { %s322_s19 = scalar_lea.vmem %s27_s15, 2048  ;;  %p327_p6 = scmp.lt.s32.totalorder %s27_s15, %s27_s15 }
   0xe   :  { %p323_p5 = scmp.ne.s32.totalorder %s27_s15, %s322_s19  ;;  %p328_p7 = scmp.lt.s32.totalorder %s322_s19, %s322_s19 }
  0x10   :  { %p329_p8 = por %p328_p7, %p327_p6 }
  0x12   :  { %p330_p9 = pnand %p329_p8, %p323_p5 }
  0x14   :  { %333 = shalt.err (!%p330_p9)
}
  0x15   :  { %s362_s20 = smov 128   ;;  %s363_s21 = smov 8  }
  0x16   :  { %32 = dma.hbm_to_vmem [thread:$0]  %s417_s1, 2048, %s27_s15, [#allocation7], %s362_s20, %s362_s20, %s363_s21  }
  0x17   :  { %354 = dma.done.wait [#allocation4], 128  }
  0x18   :  { %355 = vsyncadd [#allocation4], 4294967168 }
  0x19   :  { %356 = dma.done.wait [#allocation7], 2048  }
  0x1a   :  { %357 = vsyncadd [#allocation7], 4294965248  ;;  %v364_v0 = vmov 0.0   ;;  %vm365_vm0 = vmmov 0   ;;  %vm64_vm1 = vcmask 261120   ;;  %v63_v1 = vld [vmem:[#allocation6 + $0x78] sm:$0xff] }
  0x1b   :  { %252 = vmatprep.subr.mxu0 %v364_v0  ;;  %284 = vmatprep.mubr.msk.f32.mxu0 %vm365_vm0, %v364_v0  ;;  %v62_v2 = vld [vmem:[#allocation6 + $0x70] sm:$0xff]  ;;  %v61_v3 = vld [vmem:[#allocation6 + $0x68] sm:$0xff]  ;;  %v60_v4 = vld [vmem:[#allocation6 + $0x60] sm:$0xff]  ;;  %s366_s24 = smov [#allocation8]  }
  0x1c   :  { %253 = vmatpush3.xpose.msk.msra.mxu0 %vm64_vm1, %v63_v1  ;;  %v59_v5 = vld [vmem:[#allocation6 + $0x58] sm:$0xff]  ;;  %v58_v6 = vld [vmem:[#allocation6 + $0x50] sm:$0xff]  ;;  %v57_v7 = vld [vmem:[#allocation6 + $0x48] sm:$0xff]  ;;  %s207_s25 = sshll.u32 %s366_s24, 4  ;;  %s208_s25 = int_to_ptr.vmem [resolvable:$true] %s207_s25 }
  0x1d   :  { %254 = vmatprep.subr.mxu0 %v364_v0  ;;  %v56_v8 = vld [vmem:[#allocation6 + $0x40] sm:$0xff]  ;;  %v55_v9 = vld [vmem:[#allocation6 + $0x38] sm:$0xff]  ;;  %v54_v10 = vld [vmem:[#allocation6 + $0x30] sm:$0xff]  ;;  %s334_s26 = scalar_lea.vmem %s208_s25, 128  ;;  %p339_p11 = scmp.lt.s32.totalorder %s208_s25, %s208_s25 }
  0x1e   :  { %v53_v11 = vld [vmem:[#allocation6 + $0x28] sm:$0xff]  ;;  %v52_v12 = vld [vmem:[#allocation6 + $0x20] sm:$0xff]  ;;  %v51_v13 = vld [vmem:[#allocation6 + $0x18] sm:$0xff]  ;;  %p335_p10 = scmp.ne.s32.totalorder %s208_s25, %s334_s26  ;;  %p340_p12 = scmp.lt.s32.totalorder %s334_s26, %s334_s26 }
  0x1f   :  { %v50_v14 = vld [vmem:[#allocation6 + $0x10] sm:$0xff]  ;;  %v49_v15 = vld [vmem:[#allocation6 + $0x8] sm:$0xff]  ;;  %v48_v16 = vld [vmem:[#allocation6] sm:$0xff] }
  0x20   :  { %255 = vmatpush3.xpose.msk.msra.mxu0 %vm64_vm1, %v62_v2  ;;  %v47_v17 = vld [vmem:[#allocation3] sm:$0xff]  ;;  %p341_p13 = por %p340_p12, %p339_p11 }
  0x21   :  { %256 = vmatprep.subr.mxu0 %v364_v0  ;;  %v234_v18 = vld [vmem:[%s418_s2] ss:$0 sm:$0xff] }
  0x22   :  { %p342_p0 = pnand %p341_p13, %p335_p10 }
  0x24   :  { %257 = vmatpush3.xpose.msk.msra.mxu0 %vm64_vm1, %v61_v3 }
  0x25   :  { %258 = vmatprep.subr.mxu0 %v364_v0 }
  0x28   :  { %259 = vmatpush3.xpose.msk.msra.mxu0 %vm64_vm1, %v60_v4 }
  0x29   :  { %260 = vmatprep.subr.mxu0 %v364_v0 }
  0x2c   :  { %261 = vmatpush3.xpose.msk.msra.mxu0 %vm64_vm1, %v59_v5 }
  0x2d   :  { %262 = vmatprep.subr.mxu0 %v364_v0 }
  0x30   :  { %263 = vmatpush3.xpose.msk.msra.mxu0 %vm64_vm1, %v58_v6 }
  0x31   :  { %264 = vmatprep.subr.mxu0 %v364_v0 }
  0x34   :  { %265 = vmatpush3.xpose.msk.msra.mxu0 %vm64_vm1, %v57_v7 }
  0x35   :  { %266 = vmatprep.subr.mxu0 %v364_v0 }
  0x38   :  { %267 = vmatpush3.xpose.msk.msra.mxu0 %vm64_vm1, %v56_v8 }
  0x39   :  { %268 = vmatprep.subr.mxu0 %v364_v0 }
  0x3c   :  { %269 = vmatpush3.xpose.msk.msra.mxu0 %vm64_vm1, %v55_v9 }
  0x3d   :  { %270 = vmatprep.subr.mxu0 %v364_v0 }
  0x40   :  { %271 = vmatpush3.xpose.msk.msra.mxu0 %vm64_vm1, %v54_v10 }
  0x41   :  { %272 = vmatprep.subr.mxu0 %v364_v0 }
  0x44   :  { %273 = vmatpush3.xpose.msk.msra.mxu0 %vm64_vm1, %v53_v11 }
  0x45   :  { %274 = vmatprep.subr.mxu0 %v364_v0 }
  0x48   :  { %275 = vmatpush3.xpose.msk.msra.mxu0 %vm64_vm1, %v52_v12 }
  0x49   :  { %276 = vmatprep.subr.mxu0 %v364_v0 }
  0x4c   :  { %277 = vmatpush3.xpose.msk.msra.mxu0 %vm64_vm1, %v51_v13 }
  0x4d   :  { %278 = vmatprep.subr.mxu0 %v364_v0 }
  0x50   :  { %279 = vmatpush3.xpose.msk.msra.mxu0 %vm64_vm1, %v50_v14 }
  0x51   :  { %280 = vmatprep.subr.mxu0 %v364_v0 }
  0x54   :  { %281 = vmatpush3.xpose.msk.msra.mxu0 %vm64_vm1, %v49_v15 }
  0x55   :  { %282 = vmatprep.subr.mxu0 %v364_v0 }
  0x58   :  { %283 = vmatpush3.xpose.msk.msra.mxu0 %vm64_vm1, %v48_v16 }
  0x5b   :  { %285 = vmatmul.mubr.msk.f32.vlgmr.msra.gmra.mxu0 %vm64_vm1, %v47_v17 }
 0x11b   :  { %v182_v19 = vpop.f32.mrf.mxu0 }
 0x11c   :  { %v199_v20 = vadd.f32 %v234_v18, %v182_v19 }
 0x11d   :  { %v286_v21 = vpop.f32.mrf.mxu0 }
 0x11e   :  { %200 = vst [vmem:[#allocation8] sm:$0xff] %v199_v20 }
 0x11f   :  { %345 = shalt.err (!%p342_p0)
}
 0x120   :  { %210 = dma.vmem_to_hbm [thread:$0]  %s208_s25, 128, %s419_s3, [#allocation5]  }
 0x121   :  { %358 = dma.done.wait [#allocation5], 128  }
 0x122   :  { %359 = vsyncadd [#allocation5], 4294967168 }
 0x123   :  { %214 = vsyncpa [#allocation4], 1 }
 0x124   :  { %215 = vsyncpa [#allocation7], 1 }
 0x125   :  { %216 = vsyncpa [#allocation5], 1 }

</bundles_post_ra>
